<compile_context>
chip_gen: v7x
topology: tpu7x:2x2x1
jax: 0.10.0
libtpu: 0.0.40
codegen_flags: <defaults>
</compile_context>

<pallas_src>
import jax
import jax.numpy as jnp
from jax.experimental import pallas as pl
from jax.experimental.pallas import tpu as pltpu

HIDDEN = 32      # H of each critic; fused hidden width is 2*H = 64
OUT_PAD = 128    # last-layer output padded to a full 128-lane tile


def _round_up(x, m):
    return (x + m - 1) // m * m


# ----------------------------------------------------------------------------
# Kernel
# ----------------------------------------------------------------------------
def twin_critic_kernel(s_ref, a_ref,
                       w1s_ref, w1a_ref, b1_ref,
                       w2_ref, b2_ref, w3p_ref, b3t_ref,
                       qt_ref):
    s = s_ref[...]                                             # [tb, S]
    a = a_ref[...]                                             # [tb, A]

    # Layer 1 (concat folded into two partial matmuls), both critics fused.
    h1 = jnp.dot(s, w1s_ref[...], preferred_element_type=jnp.float32) + b1_ref[...]
    h1 = h1 + jnp.dot(a, w1a_ref[...], preferred_element_type=jnp.float32)
    h1 = jnp.maximum(h1, 0.0)                                  # [tb, 2H]

    # Layer 2 (block-diagonal -> the two critics stay independent).
    h2 = jnp.maximum(
        jnp.dot(h1, w2_ref[...], preferred_element_type=jnp.float32) + b2_ref[...],
        0.0)                                                   # [tb, 2H]

    # Layer 3, padded to 128 output lanes so the transpose is tile-native.
    qp = jnp.dot(h2, w3p_ref[...], preferred_element_type=jnp.float32)  # [tb, 128]
    qpt = qp.T                                                 # [128, tb]
    qt_ref[...] = qpt[:2, :] + b3t_ref[...]                    # [2, tb] lane-dense store


# ----------------------------------------------------------------------------
# Wrapper
# ----------------------------------------------------------------------------
def pack_twin_params(params1, params2):
    """Pack the two critics' params into one fused set (do this ONCE)."""
    w1s1, w1a1, b11, w21, b21, w31, b31 = params1
    w1s2, w1a2, b12, w22, b22, w32, b32 = params2
    H = w21.shape[0]
    z = jnp.zeros((H, H), jnp.float32)
    w1s = jnp.concatenate([w1s1, w1s2], axis=1)                # [S, 2H]
    w1a = jnp.concatenate([w1a1, w1a2], axis=1)                # [A, 2H]
    b1 = jnp.concatenate([b11, b12], axis=1)                   # [1, 2H]
    w2 = jnp.block([[w21, z], [z, w22]])                       # [2H, 2H] block-diag
    b2 = jnp.concatenate([b21, b22], axis=1)                   # [1, 2H]
    w3p = jnp.zeros((2 * H, OUT_PAD), jnp.float32)
    w3p = w3p.at[:H, 0].set(w31[:, 0]).at[H:, 1].set(w32[:, 0])  # [2H, 128]
    b3t = jnp.concatenate([b31, b32], axis=0)                  # [2, 1]
    return (w1s, w1a, b1, w2, b2, w3p, b3t)


def twin_critic(states, actions, packed, *, tb=512):
    """Returns (q1, q2), each [B, 1] float32 (matches the torch forward)."""
    B, S = states.shape
    _, A = actions.shape
    assert tb % 128 == 0, "tb must be a multiple of 128 (lane-dense output tile)"

    tb_eff = min(tb, _round_up(B, 128))
    Bp = _round_up(B, tb_eff)
    if Bp != B:
        states = jnp.pad(states, ((0, Bp - B), (0, 0)))
        actions = jnp.pad(actions, ((0, Bp - B), (0, 0)))

    def row_spec(feat):
        return pl.BlockSpec((tb_eff, feat), lambda i: (i, 0))

    def full_spec(shape):
        return pl.BlockSpec(shape, lambda i: (0, 0))

    in_specs = [row_spec(S), row_spec(A)] + [full_spec(p.shape) for p in packed]
    out_specs = pl.BlockSpec((2, tb_eff), lambda i: (0, i))
    out_shape = jax.ShapeDtypeStruct((2, Bp), jnp.float32)

    qt = pl.pallas_call(
        twin_critic_kernel,
        grid=(Bp // tb_eff,),
        in_specs=in_specs,
        out_specs=out_specs,
        out_shape=out_shape,
        compiler_params=pltpu.CompilerParams(
            dimension_semantics=("parallel",)),
    )(states, actions, *packed)

    q1 = qt[0, :B].reshape(B, 1)
    q2 = qt[1, :B].reshape(B, 1)
    return q1, q2


# ----------------------------------------------------------------------------
# Synthetic params + pure-JAX reference of the torch semantics
# ----------------------------------------------------------------------------
def init_critic_params(key, state_dim, action_dim, hidden):
    """Deterministic synthetic init (not a checkpoint load)."""
    ks = jax.random.split(key, 6)
    in_dim = state_dim + action_dim
    sc1 = 1.0 / jnp.sqrt(in_dim)
    sc2 = 1.0 / jnp.sqrt(hidden)
    w1 = jax.random.uniform(ks[0], (in_dim, hidden), jnp.float32, -sc1, sc1)
    b1 = jax.random.uniform(ks[1], (1, hidden), jnp.float32, -sc1, sc1)
    w2 = jax.random.uniform(ks[2], (hidden, hidden), jnp.float32, -sc2, sc2)
    b2 = jax.random.uniform(ks[3], (1, hidden), jnp.float32, -sc2, sc2)
    w3 = jax.random.uniform(ks[4], (hidden, 1), jnp.float32, -sc2, sc2)
    b3 = jax.random.uniform(ks[5], (1, 1), jnp.float32, -sc2, sc2)
    # split layer-1 weight into state/action halves (fuses torch.cat into matmuls)
    return (w1[:state_dim], w1[state_dim:], b1, w2, b2, w3, b3)


def _critic_ref(s, a, p):
    w1s, w1a, b1, w2, b2, w3, b3 = p
    x = jnp.concatenate([s, a], axis=1)
    w1 = jnp.concatenate([w1s, w1a], axis=0)
    h1 = jnp.maximum(x @ w1 + b1, 0.0)
    h2 = jnp.maximum(h1 @ w2 + b2, 0.0)
    return h2 @ w3 + b3


if __name__ == "__main__":
    S, A = 16, 8
    key = jax.random.PRNGKey(0)
    k_s, k_a, k_c1, k_c2, k_s2, k_a2 = jax.random.split(key, 6)

    params1 = init_critic_params(k_c1, S, A, HIDDEN)
    params2 = init_critic_params(k_c2, S, A, HIDDEN)
    packed = pack_twin_params(params1, params2)   # packed once, reused per call

    # Case 1: multi-step pipelined grid (grid=4 -> DMA/compute overlap, v7x megacore).
    B = 1024
    states = jax.random.normal(k_s, (B, S), jnp.float32)
    actions = jax.random.normal(k_a, (B, A), jnp.float32)
    q1, q2 = twin_critic(states, actions, packed, tb=256)
    jax.block_until_ready((q1, q2))
    assert q1.shape == (B, 1) and q2.shape == (B, 1)
    assert jnp.allclose(q1, _critic_ref(states, actions, params1), atol=1e-4, rtol=1e-4)
    assert jnp.allclose(q2, _critic_ref(states, actions, params2), atol=1e-4, rtol=1e-4)

    # Case 2: tiny, non-aligned batch (exercises padding + single-step path).
    Bs = 10
    s2 = jax.random.normal(k_s2, (Bs, S), jnp.float32)
    a2 = jax.random.normal(k_a2, (Bs, A), jnp.float32)
    p1, p2 = twin_critic(s2, a2, packed)
    jax.block_until_ready((p1, p2))
    assert p1.shape == (Bs, 1) and p2.shape == (Bs, 1)
    assert jnp.allclose(p1, _critic_ref(s2, a2, params1), atol=1e-4, rtol=1e-4)
    assert jnp.allclose(p2, _critic_ref(s2, a2, params2), atol=1e-4, rtol=1e-4)

    print("KERNEL_OK")
</pallas_src>

<mosaic_0001>
module attributes {stable_mosaic.version = 11 : i64} {
  func.func @twin_critic_kernel(%arg0: i32, %arg1: memref<256x16xf32, #tpu.memory_space<vmem>>, %arg2: memref<256x8xf32, #tpu.memory_space<vmem>>, %arg3: memref<16x64xf32, #tpu.memory_space<vmem>>, %arg4: memref<8x64xf32, #tpu.memory_space<vmem>>, %arg5: memref<1x64xf32, #tpu.memory_space<vmem>>, %arg6: memref<64x64xf32, #tpu.memory_space<vmem>>, %arg7: memref<1x64xf32, #tpu.memory_space<vmem>>, %arg8: memref<64x128xf32, #tpu.memory_space<vmem>>, %arg9: memref<2x1xf32, #tpu.memory_space<vmem>>, %arg10: memref<2x256xf32, #tpu.memory_space<vmem>>) attributes {dimension_semantics = [#tpu.dimension_semantics<parallel>], iteration_bounds = array<i64: 4>, scalar_prefetch = 0 : i64, scratch_operands = 0 : i64, tpu.core_type = #tpu.core_type<tc>, window_params = [{transform_indices = @transform_0, window_bounds = array<i64: 256, 16>}, {transform_indices = @transform_1, window_bounds = array<i64: 256, 8>}, {pipeline_mode = #tpu.pipeline_mode<synchronous>, transform_indices = @transform_2, window_bounds = array<i64: 16, 64>}, {pipeline_mode = #tpu.pipeline_mode<synchronous>, transform_indices = @transform_3, window_bounds = array<i64: 8, 64>}, {pipeline_mode = #tpu.pipeline_mode<synchronous>, transform_indices = @transform_4, window_bounds = array<i64: 1, 64>}, {pipeline_mode = #tpu.pipeline_mode<synchronous>, transform_indices = @transform_5, window_bounds = array<i64: 64, 64>}, {pipeline_mode = #tpu.pipeline_mode<synchronous>, transform_indices = @transform_6, window_bounds = array<i64: 1, 64>}, {pipeline_mode = #tpu.pipeline_mode<synchronous>, transform_indices = @transform_7, window_bounds = array<i64: 64, 128>}, {pipeline_mode = #tpu.pipeline_mode<synchronous>, transform_indices = @transform_8, window_bounds = array<i64: 2, 1>}, {transform_indices = @transform_9, window_bounds = array<i64: 2, 256>}]} {
    %c0 = arith.constant 0 : index
    %c0_0 = arith.constant 0 : index
    %0 = vector.load %arg1[%c0, %c0_0] : memref<256x16xf32, #tpu.memory_space<vmem>>, vector<256x16xf32>
    %c0_1 = arith.constant 0 : index
    %c0_2 = arith.constant 0 : index
    %1 = vector.load %arg2[%c0_1, %c0_2] : memref<256x8xf32, #tpu.memory_space<vmem>>, vector<256x8xf32>
    %c0_3 = arith.constant 0 : index
    %c0_4 = arith.constant 0 : index
    %2 = vector.load %arg3[%c0_3, %c0_4] : memref<16x64xf32, #tpu.memory_space<vmem>>, vector<16x64xf32>
    %cst = arith.constant dense<0.000000e+00> : vector<256x64xf32>
    %3 = tpu.matmul %0, %2, %cst {dimension_numbers = #tpu.dot_dimension_numbers<[1], [0], [0], [1], [0, 0, 1, 1], [], []>} : vector<256x16xf32>, vector<16x64xf32>, vector<256x64xf32> -> vector<256x64xf32>
    %c0_5 = arith.constant 0 : index
    %c0_6 = arith.constant 0 : index
    %4 = vector.load %arg5[%c0_5, %c0_6] : memref<1x64xf32, #tpu.memory_space<vmem>>, vector<1x64xf32>
    %5 = vector.broadcast %4 : vector<1x64xf32> to vector<256x64xf32>
    %6 = arith.addf %3, %5 : vector<256x64xf32>
    %c0_7 = arith.constant 0 : index
    %c0_8 = arith.constant 0 : index
    %7 = vector.load %arg4[%c0_7, %c0_8] : memref<8x64xf32, #tpu.memory_space<vmem>>, vector<8x64xf32>
    %cst_9 = arith.constant dense<0.000000e+00> : vector<256x64xf32>
    %8 = tpu.matmul %1, %7, %cst_9 {dimension_numbers = #tpu.dot_dimension_numbers<[1], [0], [0], [1], [0, 0, 1, 1], [], []>} : vector<256x8xf32>, vector<8x64xf32>, vector<256x64xf32> -> vector<256x64xf32>
    %9 = arith.addf %6, %8 : vector<256x64xf32>
    %cst_10 = arith.constant 0.000000e+00 : f32
    %10 = vector.broadcast %cst_10 : f32 to vector<256x64xf32>
    %11 = arith.maximumf %9, %10 : vector<256x64xf32>
    %c0_11 = arith.constant 0 : index
    %c0_12 = arith.constant 0 : index
    %12 = vector.load %arg6[%c0_11, %c0_12] : memref<64x64xf32, #tpu.memory_space<vmem>>, vector<64x64xf32>
    %cst_13 = arith.constant dense<0.000000e+00> : vector<256x64xf32>
    %13 = tpu.matmul %11, %12, %cst_13 {dimension_numbers = #tpu.dot_dimension_numbers<[1], [0], [0], [1], [0, 0, 1, 1], [], []>} : vector<256x64xf32>, vector<64x64xf32>, vector<256x64xf32> -> vector<256x64xf32>
    %c0_14 = arith.constant 0 : index
    %c0_15 = arith.constant 0 : index
    %14 = vector.load %arg7[%c0_14, %c0_15] : memref<1x64xf32, #tpu.memory_space<vmem>>, vector<1x64xf32>
    %15 = vector.broadcast %14 : vector<1x64xf32> to vector<256x64xf32>
    %16 = arith.addf %13, %15 : vector<256x64xf32>
    %cst_16 = arith.constant 0.000000e+00 : f32
    %17 = vector.broadcast %cst_16 : f32 to vector<256x64xf32>
    %18 = arith.maximumf %16, %17 : vector<256x64xf32>
    %c0_17 = arith.constant 0 : index
    %c0_18 = arith.constant 0 : index
    %19 = vector.load %arg8[%c0_17, %c0_18] : memref<64x128xf32, #tpu.memory_space<vmem>>, vector<64x128xf32>
    %cst_19 = arith.constant dense<0.000000e+00> : vector<256x128xf32>
    %20 = tpu.matmul %18, %19, %cst_19 {dimension_numbers = #tpu.dot_dimension_numbers<[1], [0], [0], [1], [0, 0, 1, 1], [], []>} : vector<256x64xf32>, vector<64x128xf32>, vector<256x128xf32> -> vector<256x128xf32>
    %21 = tpu.transpose %20, [1, 0] : vector<256x128xf32> -> vector<128x256xf32>
    %22 = vector.extract_strided_slice %21 {offsets = [0, 0], sizes = [2, 256], strides = [1, 1]} : vector<128x256xf32> to vector<2x256xf32>
    %c0_20 = arith.constant 0 : index
    %c0_21 = arith.constant 0 : index
    %23 = vector.load %arg9[%c0_20, %c0_21] : memref<2x1xf32, #tpu.memory_space<vmem>>, vector<2x1xf32>
    %24 = vector.broadcast %23 : vector<2x1xf32> to vector<2x256xf32>
    %25 = arith.addf %22, %24 : vector<2x256xf32>
    %c0_22 = arith.constant 0 : index
    %c0_23 = arith.constant 0 : index
    %26 = vector.load %arg10[%c0_22, %c0_23] : memref<2x256xf32, #tpu.memory_space<vmem>>, vector<2x256xf32>
    tpu.vector_store %arg10[%c0_22, %c0_23], %25 {strides = array<i32>} : memref<2x256xf32, #tpu.memory_space<vmem>>, vector<2x256xf32>,
    return
  }
  func.func @transform_0(%arg0: i32) -> (i32, i32) {
    %c0_i32 = arith.constant 0 : i32
    %c0_i32_0 = arith.constant 0 : i32
    return %arg0, %c0_i32 : i32, i32
  }
  func.func @transform_1(%arg0: i32) -> (i32, i32) {
    %c0_i32 = arith.constant 0 : i32
    %c0_i32_0 = arith.constant 0 : i32
    return %arg0, %c0_i32 : i32, i32
  }
  func.func @transform_2(%arg0: i32) -> (i32, i32) {
    %c0_i32 = arith.constant 0 : i32
    %c0_i32_0 = arith.constant 0 : i32
    %c0_i32_1 = arith.constant 0 : i32
    return %c0_i32, %c0_i32_0 : i32, i32
  }
  func.func @transform_3(%arg0: i32) -> (i32, i32) {
    %c0_i32 = arith.constant 0 : i32
    %c0_i32_0 = arith.constant 0 : i32
    %c0_i32_1 = arith.constant 0 : i32
    return %c0_i32, %c0_i32_0 : i32, i32
  }
  func.func @transform_4(%arg0: i32) -> (i32, i32) {
    %c0_i32 = arith.constant 0 : i32
    %c0_i32_0 = arith.constant 0 : i32
    %c0_i32_1 = arith.constant 0 : i32
    return %c0_i32, %c0_i32_0 : i32, i32
  }
  func.func @transform_5(%arg0: i32) -> (i32, i32) {
    %c0_i32 = arith.constant 0 : i32
    %c0_i32_0 = arith.constant 0 : i32
    %c0_i32_1 = arith.constant 0 : i32
    return %c0_i32, %c0_i32_0 : i32, i32
  }
  func.func @transform_6(%arg0: i32) -> (i32, i32) {
    %c0_i32 = arith.constant 0 : i32
    %c0_i32_0 = arith.constant 0 : i32
    %c0_i32_1 = arith.constant 0 : i32
    return %c0_i32, %c0_i32_0 : i32, i32
  }
  func.func @transform_7(%arg0: i32) -> (i32, i32) {
    %c0_i32 = arith.constant 0 : i32
    %c0_i32_0 = arith.constant 0 : i32
    %c0_i32_1 = arith.constant 0 : i32
    return %c0_i32, %c0_i32_0 : i32, i32
  }
  func.func @transform_8(%arg0: i32) -> (i32, i32) {
    %c0_i32 = arith.constant 0 : i32
    %c0_i32_0 = arith.constant 0 : i32
    %c0_i32_1 = arith.constant 0 : i32
    return %c0_i32, %c0_i32_0 : i32, i32
  }
  func.func @transform_9(%arg0: i32) -> (i32, i32) {
    %c0_i32 = arith.constant 0 : i32
    %c0_i32_0 = arith.constant 0 : i32
    return %c0_i32, %arg0 : i32, i32
  }
}

</mosaic_0001>

<bundles_post_ra>
// kernel: tpu_custom_call.1
= control target key start
LH: loop header
LB: loop body
LE: loop exit
PB: predicated region body
PF: predicated region fallthrough
CT: control target
= control target key end

     0   :  { %14 = vsyncpa [#allocation3], 0  ;;  %s3260_s0 = inlined_call_operand.vmem [shape: f32[1024,16], index: 0, kind: input, shape index: {}]   ;;  %s3261_s1 = inlined_call_operand.vmem [shape: f32[1024,8], index: 1, kind: input, shape index: {}]   ;;  %s3262_s2 = inlined_call_operand.vmem [shape: f32[16,64], index: 2, kind: input, shape index: {}]   ;;  %s3263_s3 = inlined_call_operand.vmem [shape: f32[8,64], index: 3, kind: input, shape index: {}]   ;;  %s3264_s4 = inlined_call_operand.vmem [shape: f32[1,64], index: 4, kind: input, shape index: {}]   ;;  %s3265_s5 = inlined_call_operand.vmem [shape: f32[64,64], index: 5, kind: input, shape index: {}]   ;;  %s3266_s6 = inlined_call_operand.vmem [shape: f32[1,64], index: 6, kind: input, shape index: {}]   ;;  %s3267_s7 = inlined_call_operand.vmem [shape: f32[64,128], index: 7, kind: input, shape index: {}]   ;;  %s3268_s8 = inlined_call_operand.vmem [shape: f32[2,1], index: 8, kind: input, shape index: {}]   ;;  %s3269_s9 = inlined_call_operand.hbm [shape: f32[2,1024], index: 9, kind: output, shape index: {}]  }
   0x1   :  { %16 = vsyncpa [#allocation3 + $0x1], 0  ;;  %s2795_s30 = smov 0   ;;  %s2797_s10 = smov 0  }
   0x2   :  { %s2799_s11 = smov 0   ;;  %s2801_s12 = smov 0  }
   0x3 LB: > { %s2816_s13 = sadd.s32 4294967295, %s2741_s12   ;;  %s2006_s14 = sadd.s32 4294967294, %s2741_s12   ;;  %s2741_s12 = sphi %s2801_s12, %s3275_s12   ;;  %s2737_s11 = sphi %s2799_s11, %s3274_s11   ;;  %s2733_s10 = sphi %s2797_s10, %s3273_s10   ;;  %s2729_s30 = sphi %s2795_s30, %s3272_s30  }
   0x4   : > { %s2820_s15 = sadd.s32 1, %s2741_s12   ;;  %s228_s16 = sadd.s32 1, %s2737_s11 }
   0x5   : > { %s225_s17 = ssub.s32 %s2741_s12, %s2820_s15  ;;  %p238_p0 = scmp.ne.s32.totalorder %s2737_s11, %s2733_s10 }
   0x6   : > { %p226_p1 = scmp.eq.s32.totalorder %s225_s17, 0  ;;  %p239_p2 = scmp.eq.s32.totalorder %s2816_s13, 3 }
   0x7   : > { %p244_p3 = scmp.ne.s32.totalorder %s2733_s10, %s2729_s30  ;;  %p245_p4 = scmp.eq.s32.totalorder %s2006_s14, 3 }
   0x8   : > { %s2831_s18 = scalar_select %p226_p1, %s2737_s11, %s228_s16  }
   0x9   : > { %p2833_p5 = por %p239_p2, %p238_p0  ;;  %p2837_p6 = por %p245_p4, %p244_p3 }
   0xa   : > { %p2009_p7 = scmp.ge.s32.totalorder %s2741_s12, 1  ;;  %p302_p8 = scmp.lt.s32.totalorder %s2741_s12, 5 }
   0xc   : > { %p303_p9 = pnand %p2009_p7, %p302_p8 }
   0xd   : > { %v420_v0 = vld [vmem:[%s3262_s2] sm:$0xff] (!%p303_p9)  ;;  %v421_v1 = vld [vmem:[%s3262_s2 + $0x8] sm:$0xff] (!%p303_p9)  ;;  %s2011_s25 = sshll.u32 (!%p303_p9), %s2816_s13, 5  ;;  %vm429_vm0 = vcmask (!%p303_p9), 130048   ;;  %v1140_v7 = vld [vmem:[%s3265_s5 + $0x10] sm:$0xff] (!%p303_p9)  ;;  %vm752_vm1 = vcmask (!%p303_p9), 64512  }
   0xe   : > { %306 = sbr.rel (%p303_p9) target bundleno = 918 (0x396), region = 56  ;;  %v2529_v2 = vpack.c.bf16 (!%p303_p9), %v421_v1, %v420_v0  ;;  %p344_p10 = scmp.lt.s32.totalorder (!%p303_p9), %s2011_s25, 127  ;;  %v751_v3 = vld [vmem:[%s3263_s3] sm:$0xff] (!%p303_p9)  ;;  %v1139_v5 = vld [vmem:[%s3265_s5 + $0x8] sm:$0xff] (!%p303_p9)  ;;  %v1141_v8 = vld [vmem:[%s3265_s5 + $0x18] sm:$0xff] (!%p303_p9)  ;;  %vm1153_vm2 = vcmask (!%p303_p9), 523264  }
   0xf   : > { %v1138_v4 = vld [vmem:[%s3265_s5] sm:$0xff] (!%p303_p9)  ;;  %v2883_v12 = vpack.c.bf16 (!%p303_p9), %v1141_v8, %v1140_v7  ;;  %v1143_v14 = vld [vmem:[%s3265_s5 + $0x28] sm:$0xff] (!%p303_p9)  ;;  %v1144_v26 = vld [vmem:[%s3265_s5 + $0x30] sm:$0xff] (!%p303_p9)  ;;  %s340_s14 = sand.u32 (!%p303_p9), 1, %s2733_s10  }
  0x10   : > { %2530 = vmatprep.subr.bf16.mxu0 (!%p303_p9), %v2529_v2  ;;  %v2869_v6 = vpack.c.bf16 (!%p303_p9), %v1139_v5, %v1138_v4  ;;  %v1142_v13 = vld [vmem:[%s3265_s5 + $0x20] sm:$0xff] (!%p303_p9)  ;;  %v1145_v27 = vld [vmem:[%s3265_s5 + $0x38] sm:$0xff] (!%p303_p9)  ;;  %s1921_s24 = scalar_lea.sflag (!%p303_p9), [#allocation3], %s340_s14 }
  0x11   : > { %2532 = vmatpush3.bf16.msra.mxu0 (!%p303_p9), %v2529_v2  ;;  %v2897_v17 = vpack.c.bf16 (!%p303_p9), %v1143_v14, %v1142_v13  ;;  %v2925_v28 = vpack.c.bf16 (!%p303_p9), %v1145_v27, %v1144_v26 }
  0x12   : > { %2351 = vmatprep.subr.mxu0 (!%p303_p9), %v751_v3  ;;  %2565 = vmatprep.subr.bf16.mxu1 (!%p303_p9), %v2869_v6 }
  0x13   : > { %2569 = vmatpush3.bf16.msra.mxu1 (!%p303_p9), %v2869_v6 }
  0x14   : > { %2566 = vmatprep.subr.bf16.mxu1 (!%p303_p9), %v2883_v12 }
  0x15   : > { %s3277_s25 = smov (!%p344_p10, %s2011_s25), 127 }
  0x16   : > { %s2012_s28 = sshll.u32 %s3277_s25, 3  ;;  %s2151_s25 = sshll.u32 %s2816_s13, 6 }
  0x17   : > { %s2867_s23 = scalar_lea.vmem %s3260_s0, %s2012_s28  ;;  %2570 = vmatpush3.bf16.msra.mxu1 %v2883_v12  ;;  %s2969_s16 = scalar_lea.vmem %s3261_s1, %s2012_s28 }
  0x18   : > { %v356_v9 = vld [vmem:[%s2867_s23] sm:$0xff]  ;;  %v357_v10 = vld [vmem:[%s2867_s23 + $0x8] sm:$0xff]  ;;  %v358_v11 = vld [vmem:[%s2867_s23 + $0x10] sm:$0xff]  ;;  %2567 = vmatprep.subr.bf16.mxu1 %v2897_v17  ;;  %s3218_s22 = scalar_lea.hbm %s3269_s9, %s2151_s25  ;;  %s2744_s13 = smov [#allocation2]  }
  0x19   : > { %2303 = vmatprep.mubr.msk.f32.mxu0 %vm429_vm0, %v356_v9  ;;  %v359_v15 = vld [vmem:[%s2867_s23 + $0x18] sm:$0xff]  ;;  %v360_v16 = vld [vmem:[%s2867_s23 + $0x20] sm:$0xff]  ;;  %v361_v18 = vld [vmem:[%s2867_s23 + $0x28] sm:$0xff]  ;;  %s2683_s27 = sshll.u32 %s2744_s13, 4  ;;  %s2684_s27 = int_to_ptr.vmem [resolvable:$false] %s2683_s27 }
  0x1a   : > { %2304 = vmatmul.mubr.msk.f32.vlgmr.msra.gmra.mrb[0].mxu0 %vm429_vm0, %v357_v10  ;;  %v362_v19 = vld [vmem:[%s2867_s23 + $0x30] sm:$0xff]  ;;  %v363_v20 = vld [vmem:[%s2867_s23 + $0x38] sm:$0xff]  ;;  %v364_v21 = vld [vmem:[%s2867_s23 + $0x40] sm:$0xff]  ;;  %s2685_s29 = scalar_lea.vmem %s2684_s27, 128 }
  0x1b   : > { %2352 = vmatpush3.msra.mxu0 %v751_v3  ;;  %2306 = vmatprep.mubr.msk.f32.mxu0 %vm429_vm0, %v358_v11  ;;  %v365_v22 = vld [vmem:[%s2867_s23 + $0x48] sm:$0xff]  ;;  %v366_v23 = vld [vmem:[%s2867_s23 + $0x50] sm:$0xff]  ;;  %v367_v24 = vld [vmem:[%s2867_s23 + $0x58] sm:$0xff] }
  0x1c   : > { %2534 = vmatprep.subr.bf16.mxu0 %v2869_v6  ;;  %2571 = vmatpush3.bf16.msra.mxu1 %v2897_v17  ;;  %v368_v25 = vld [vmem:[%s2867_s23 + $0x60] sm:$0xff]  ;;  %v369_v29 = vld [vmem:[%s2867_s23 + $0x68] sm:$0xff]  ;;  %v370_v30 = vld [vmem:[%s2867_s23 + $0x70] sm:$0xff] }
  0x1d   : > { %2568 = vmatprep.subr.bf16.mxu1 %v2925_v28  ;;  %v371_v31 = vld [vmem:[%s2867_s23 + $0x78] sm:$0xff]  ;;  %v372_v32 = vld [vmem:[%s2867_s23 + $0x80] sm:$0xff]  ;;  %v373_v33 = vld [vmem:[%s2867_s23 + $0x88] sm:$0xff] }
  0x1e   : > { %2307 = vmatmul.mubr.msk.f32.gmra.mrb[2].mxu0 %vm429_vm0, %v359_v15  ;;  %v374_v34 = vld [vmem:[%s2867_s23 + $0x90] sm:$0xff]  ;;  %v375_v35 = vld [vmem:[%s2867_s23 + $0x98] sm:$0xff]  ;;  %v376_v36 = vld [vmem:[%s2867_s23 + $0xa0] sm:$0xff] }
  0x1f   : > { %2309 = vmatprep.mubr.msk.f32.mxu0 %vm429_vm0, %v360_v16  ;;  %v377_v37 = vld [vmem:[%s2867_s23 + $0xa8] sm:$0xff]  ;;  %v378_v38 = vld [vmem:[%s2867_s23 + $0xb0] sm:$0xff]  ;;  %v379_v39 = vld [vmem:[%s2867_s23 + $0xb8] sm:$0xff] }
  0x20   : > { %2572 = vmatpush3.bf16.msra.mxu1 %v2925_v28  ;;  %v380_v40 = vld [vmem:[%s2867_s23 + $0xc0] sm:$0xff]  ;;  %v381_v41 = vld [vmem:[%s2867_s23 + $0xc8] sm:$0xff]  ;;  %v382_v42 = vld [vmem:[%s2867_s23 + $0xd0] sm:$0xff] }
  0x21   : > { %v383_v43 = vld [vmem:[%s2867_s23 + $0xd8] sm:$0xff]  ;;  %v384_v44 = vld [vmem:[%s2867_s23 + $0xe0] sm:$0xff]  ;;  %v385_v45 = vld [vmem:[%s2867_s23 + $0xe8] sm:$0xff] }
  0x22   : > { %2310 = vmatmul.mubr.msk.f32.gmra.mrb[4].mxu0 %vm429_vm0, %v361_v18  ;;  %v386_v46 = vld [vmem:[%s2867_s23 + $0xf0] sm:$0xff]  ;;  %v387_v47 = vld [vmem:[%s2867_s23 + $0xf8] sm:$0xff]  ;;  %v388_v48 = vld [vmem:[%s2969_s16] sm:$0xff] }
  0x23   : > { %2312 = vmatprep.mubr.msk.f32.mxu0 %vm429_vm0, %v362_v19  ;;  %v389_v49 = vld [vmem:[%s2969_s16 + $0x8] sm:$0xff]  ;;  %v390_v50 = vld [vmem:[%s2969_s16 + $0x10] sm:$0xff]  ;;  %v391_v51 = vld [vmem:[%s2969_s16 + $0x18] sm:$0xff] }
  0x24   : > { %v392_v52 = vld [vmem:[%s2969_s16 + $0x20] sm:$0xff]  ;;  %v393_v53 = vld [vmem:[%s2969_s16 + $0x28] sm:$0xff]  ;;  %v394_v54 = vld [vmem:[%s2969_s16 + $0x30] sm:$0xff] }
  0x25   : > { %v395_v55 = vld [vmem:[%s2969_s16 + $0x38] sm:$0xff]  ;;  %v396_v56 = vld [vmem:[%s2969_s16 + $0x40] sm:$0xff]  ;;  %v397_v57 = vld [vmem:[%s2969_s16 + $0x48] sm:$0xff] }
  0x26   : > { %2313 = vmatmul.mubr.msk.f32.gmra.mrb[6].mxu0 %vm429_vm0, %v363_v20  ;;  %v398_v58 = vld [vmem:[%s2969_s16 + $0x50] sm:$0xff]  ;;  %v399_v59 = vld [vmem:[%s2969_s16 + $0x58] sm:$0xff]  ;;  %v400_v60 = vld [vmem:[%s2969_s16 + $0x60] sm:$0xff] }
  0x27   : > { %2315 = vmatprep.mubr.msk.f32.mxu0 %vm429_vm0, %v364_v21  ;;  %v401_v61 = vld [vmem:[%s2969_s16 + $0x68] sm:$0xff]  ;;  %v402_v62 = vld [vmem:[%s2969_s16 + $0x70] sm:$0xff]  ;;  %v403_v63 = vld [vmem:[%s2969_s16 + $0x78] sm:$0xff] }
  0x28   : > { %v404_v0 = vld [vmem:[%s2969_s16 + $0x80] sm:$0xff]  ;;  %v405_v1 = vld [vmem:[%s2969_s16 + $0x88] sm:$0xff]  ;;  %v406_v2 = vld [vmem:[%s2969_s16 + $0x90] sm:$0xff] }
  0x29   : > { %v407_v3 = vld [vmem:[%s2969_s16 + $0x98] sm:$0xff]  ;;  %v408_v4 = vld [vmem:[%s2969_s16 + $0xa0] sm:$0xff]  ;;  %v409_v5 = vld [vmem:[%s2969_s16 + $0xa8] sm:$0xff] }
  0x2a   : > { %2316 = vmatmul.mubr.msk.f32.gmra.mrb[8].mxu0 %vm429_vm0, %v365_v22  ;;  %v411_v7 = vld [vmem:[%s2969_s16 + $0xb8] sm:$0xff]  ;;  %v412_v8 = vld [vmem:[%s2969_s16 + $0xc0] sm:$0xff]  ;;  %v413_v9 = vld [vmem:[%s2969_s16 + $0xc8] sm:$0xff] }
  0x2b   : > { %2318 = vmatprep.mubr.msk.f32.mxu0 %vm429_vm0, %v366_v23  ;;  %v414_v10 = vld [vmem:[%s2969_s16 + $0xd0] sm:$0xff]  ;;  %v415_v11 = vld [vmem:[%s2969_s16 + $0xd8] sm:$0xff]  ;;  %v417_v13 = vld [vmem:[%s2969_s16 + $0xe8] sm:$0xff] }
  0x2c   : > { %v418_v14 = vld [vmem:[%s2969_s16 + $0xf0] sm:$0xff]  ;;  %v419_v15 = vld [vmem:[%s2969_s16 + $0xf8] sm:$0xff]  ;;  %v1507_v16 = vld [vmem:[%s3267_s7] sm:$0xff] }
  0x2d   : > { %v3055_v19 = vld [vmem:[%s3264_s4] ss:$0 sm:$0xff] }
  0x2e   : > { %2319 = vmatmul.mubr.msk.f32.gmra.mrb[10].mxu0 %vm429_vm0, %v367_v24 }
  0x2f   : > { %2321 = vmatprep.mubr.msk.f32.mxu0 %vm429_vm0, %v368_v25 }
  0x32   : > { %2322 = vmatmul.mubr.msk.f32.gmra.mrb[12].mxu0 %vm429_vm0, %v369_v29 }
  0x33   : > { %2324 = vmatprep.mubr.msk.f32.mxu0 %vm429_vm0, %v370_v30  ;;  %v1509_v30 = vld [vmem:[%s3267_s7 + $0x10] sm:$0xff] }
  0x36   : > { %2325 = vmatmul.mubr.msk.f32.gmra.mrb[14].mxu0 %vm429_vm0, %v371_v31  ;;  %v1510_v31 = vld [vmem:[%s3267_s7 + $0x18] sm:$0xff] }
  0x37   : > { %2327 = vmatprep.mubr.msk.f32.mxu0 %vm429_vm0, %v372_v32 }
  0x3a   : > { %2328 = vmatmul.mubr.msk.f32.gmra.mrb[16].mxu0 %vm429_vm0, %v373_v33 }
  0x3b   : > { %2330 = vmatprep.mubr.msk.f32.mxu0 %vm429_vm0, %v374_v34 }
  0x3e   : > { %2331 = vmatmul.mubr.msk.f32.gmra.mrb[18].mxu0 %vm429_vm0, %v375_v35 }
  0x3f   : > { %2333 = vmatprep.mubr.msk.f32.mxu0 %vm429_vm0, %v376_v36 }
  0x42   : > { %2334 = vmatmul.mubr.msk.f32.gmra.mrb[20].mxu0 %vm429_vm0, %v377_v37  ;;  %v2553_v37 = vpack.c.bf16 %v1510_v31, %v1509_v30 }
  0x43   : > { %2336 = vmatprep.mubr.msk.f32.mxu0 %vm429_vm0, %v378_v38 }
  0x46   : > { %2337 = vmatmul.mubr.msk.f32.gmra.mrb[22].mxu0 %vm429_vm0, %v379_v39  ;;  %v1511_v39 = vld [vmem:[%s3267_s7 + $0x20] sm:$0xff] }
  0x47   : > { %2339 = vmatprep.mubr.msk.f32.mxu0 %vm429_vm0, %v380_v40  ;;  %v1512_v40 = vld [vmem:[%s3267_s7 + $0x28] sm:$0xff] }
  0x4a   : > { %2340 = vmatmul.mubr.msk.f32.gmra.mrb[24].mxu0 %vm429_vm0, %v381_v41 }
  0x4b   : > { %2342 = vmatprep.mubr.msk.f32.mxu0 %vm429_vm0, %v382_v42 }
  0x4e   : > { %2343 = vmatmul.mubr.msk.f32.gmra.mrb[26].mxu0 %vm429_vm0, %v383_v43 }
  0x4f   : > { %2345 = vmatprep.mubr.msk.f32.mxu0 %vm429_vm0, %v384_v44 }
  0x52   : > { %2346 = vmatmul.mubr.msk.f32.gmra.mrb[28].mxu0 %vm429_vm0, %v385_v45 }
  0x53   : > { %2348 = vmatprep.mubr.msk.f32.mxu0 %vm429_vm0, %v386_v46  ;;  %v2557_v46 = vpack.c.bf16 %v1512_v40, %v1511_v39 }
  0x56   : > { %2349 = vmatmul.mubr.msk.f32.gmra.mrb[30].mxu0 %vm429_vm0, %v387_v47 }
  0x57   : > { %2353 = vmatprep.mubr.msk.f32.mxu0 %vm752_vm1, %v388_v48  ;;  %v1513_v48 = vld [vmem:[%s3267_s7 + $0x30] sm:$0xff] }
  0x5a   : > { %2354 = vmatmul.mubr.msk.f32.vlgmr.msra.gmra.mrb[0].mxu0 %vm752_vm1, %v389_v49  ;;  %v1514_v49 = vld [vmem:[%s3267_s7 + $0x38] sm:$0xff] }
  0x5b   : > { %2356 = vmatprep.mubr.msk.f32.mxu0 %vm752_vm1, %v390_v50  ;;  %2536 = vmatpush3.bf16.msra.mxu0 %v2869_v6  ;;  %v410_v6 = vld [vmem:[%s2969_s16 + $0xb0] sm:$0xff] }
  0x5c   : > { %2538 = vmatprep.subr.bf16.mxu0 %v2883_v12 }
  0x5e   : > { %2357 = vmatmul.mubr.msk.f32.gmra.mrb[2].mxu0 %vm752_vm1, %v391_v51 }
  0x5f   : > { %2359 = vmatprep.mubr.msk.f32.mxu0 %vm752_vm1, %v392_v52  ;;  %2540 = vmatpush3.bf16.msra.mxu0 %v2883_v12  ;;  %v416_v12 = vld [vmem:[%s2969_s16 + $0xe0] sm:$0xff]  ;;  %s2010_s16 = sshll.u32 %s340_s14, 2 }
  0x60   : > { %2542 = vmatprep.subr.bf16.mxu0 %v2897_v17  ;;  %s342_s28 = scalar_lea.vmem [#allocation2], %s2010_s16 }
  0x61   : > { %s1935_s23 = sshll.u32 %s342_s28, 4  ;;  %s3220_s23 = int_to_ptr.vmem [resolvable:$true] %s1935_s23 }
  0x62   : > { %2360 = vmatmul.mubr.msk.f32.gmra.mrb[4].mxu0 %vm752_vm1, %v393_v53  ;;  %s2679_s26 = scalar_lea.vmem %s3220_s23, 64  ;;  %p2686_p0 = scmp.lt.s32.totalorder %s3220_s23, %s2684_s27 }
  0x63   : > { %2362 = vmatprep.mubr.msk.f32.mxu0 %vm752_vm1, %v394_v54  ;;  %2544 = vmatpush3.bf16.msra.mxu0 %v2897_v17  ;;  %v1508_v17 = vld [vmem:[%s3267_s7 + $0x8] sm:$0xff]  ;;  %p2680_p11 = scmp.ne.s32.totalorder %s3220_s23, %s2679_s26  ;;  %p2687_p1 = scmp.lt.s32.totalorder %s2685_s29, %s2679_s26 }
  0x64   : > { %2546 = vmatprep.subr.bf16.mxu0 %v2925_v28  ;;  %v2549_v18 = vpack.c.bf16 %v1508_v17, %v1507_v16 }
  0x65   : > { %p2681_p12 = pnand %p2680_p11, %p2833_p5  ;;  %p2688_p2 = por %p2687_p1, %p2686_p0 }
  0x66   : > { %2363 = vmatmul.mubr.msk.f32.gmra.mrb[6].mxu0 %vm752_vm1, %v395_v55  ;;  %2550 = vmatprep.subr.bf16.mxu1 %v2549_v18  ;;  %v2561_v55 = vpack.c.bf16 %v1514_v49, %v1513_v48 }
  0x67   : > { %2365 = vmatprep.mubr.msk.f32.mxu0 %vm752_vm1, %v396_v56  ;;  %2548 = vmatpush3.bf16.msra.mxu0 %v2925_v28  ;;  %p2682_p13 = pneg %p2681_p12 }
  0x69   : > { %p2689_p3 = pnand %p2688_p2, %p2682_p13 }
  0x6a   : > { %2366 = vmatmul.mubr.msk.f32.gmra.mrb[8].mxu0 %vm752_vm1, %v397_v57 }
  0x6b   : > { %2368 = vmatprep.mubr.msk.f32.mxu0 %vm752_vm1, %v398_v58 }
  0x6e   : > { %2369 = vmatmul.mubr.msk.f32.gmra.mrb[10].mxu0 %vm752_vm1, %v399_v59 }
  0x6f   : > { %2371 = vmatprep.mubr.msk.f32.mxu0 %vm752_vm1, %v400_v60 }
  0x72   : > { %2372 = vmatmul.mubr.msk.f32.gmra.mrb[12].mxu0 %vm752_vm1, %v401_v61 }
  0x73   : > { %2374 = vmatprep.mubr.msk.f32.mxu0 %vm752_vm1, %v402_v62 }
  0x76   : > { %2375 = vmatmul.mubr.msk.f32.gmra.mrb[14].mxu0 %vm752_vm1, %v403_v63 }
  0x77   : > { %2377 = vmatprep.mubr.msk.f32.mxu0 %vm752_vm1, %v404_v0 }
  0x7a   : > { %2378 = vmatmul.mubr.msk.f32.gmra.mrb[16].mxu0 %vm752_vm1, %v405_v1 }
  0x7b   : > { %2380 = vmatprep.mubr.msk.f32.mxu0 %vm752_vm1, %v406_v2 }
  0x7e   : > { %2381 = vmatmul.mubr.msk.f32.gmra.mrb[18].mxu0 %vm752_vm1, %v407_v3 }
  0x7f   : > { %2383 = vmatprep.mubr.msk.f32.mxu0 %vm752_vm1, %v408_v4 }
  0x82   : > { %2384 = vmatmul.mubr.msk.f32.gmra.mrb[20].mxu0 %vm752_vm1, %v409_v5 }
  0x83   : > { %2386 = vmatprep.mubr.msk.f32.mxu0 %vm752_vm1, %v410_v6 }
  0x86   : > { %2387 = vmatmul.mubr.msk.f32.gmra.mrb[22].mxu0 %vm752_vm1, %v411_v7 }
  0x87   : > { %2389 = vmatprep.mubr.msk.f32.mxu0 %vm752_vm1, %v412_v8 }
  0x8a   : > { %2390 = vmatmul.mubr.msk.f32.gmra.mrb[24].mxu0 %vm752_vm1, %v413_v9 }
  0x8b   : > { %2392 = vmatprep.mubr.msk.f32.mxu0 %vm752_vm1, %v414_v10 }
  0x8e   : > { %2393 = vmatmul.mubr.msk.f32.gmra.mrb[26].mxu0 %vm752_vm1, %v415_v11 }
  0x8f   : > { %2395 = vmatprep.mubr.msk.f32.mxu0 %vm752_vm1, %v416_v12 }
  0x92   : > { %2396 = vmatmul.mubr.msk.f32.gmra.mrb[28].mxu0 %vm752_vm1, %v417_v13 }
  0x93   : > { %2398 = vmatprep.mubr.msk.f32.mxu0 %vm752_vm1, %v418_v14 }
  0x96   : > { %2399 = vmatmul.mubr.msk.f32.gmra.mrb[30].mxu0 %vm752_vm1, %v419_v15 }
 0x12d   : > { %v2355_v20 = vpop.f32.mrb[0].mxu0 }
 0x12e   : > { %v2573_v21 = vadd.f32 %v2355_v20, %v3055_v19  ;;  %v915_v22 = vpop.f32.mrb[1].mxu0 }
 0x12f   : > { %v2574_v23 = vadd.f32 %v3055_v19, %v915_v22 }
 0x130   : > { %v1107_v26 = vmax.f32 %v2573_v21, 0.0 }
 0x131   : > { %v1106_v24 = vmax.f32 %v2574_v23, 0.0  ;;  %v2358_v25 = vpop.f32.mrb[2].mxu0 }
 0x132   : > { %v2575_v27 = vadd.f32 %v2358_v25, %v3055_v19  ;;  %v925_v28 = vpop.f32.mrb[3].mxu0 }
 0x133   : > { %v2576_v29 = vadd.f32 %v3055_v19, %v925_v28  ;;  %2417 = vmatprep.mubr.msk.f32.mxu0 %vm1153_vm2, %v1106_v24 }
 0x134   : > { %2418 = vmatmul.mubr.msk.f32.vlgmr.msra.gmra.mrb[32].mxu0 %vm1153_vm2, %v1107_v26  ;;  %v1109_v34 = vmax.f32 %v2575_v27, 0.0 }
 0x135   : > { %v1108_v32 = vmax.f32 %v2576_v29, 0.0  ;;  %v2361_v33 = vpop.f32.mrb[4].mxu0 }
 0x136   : > { %v2577_v35 = vadd.f32 %v2361_v33, %v3055_v19  ;;  %v935_v36 = vpop.f32.mrb[5].mxu0 }
 0x137   : > { %v2578_v38 = vadd.f32 %v3055_v19, %v935_v36  ;;  %2420 = vmatprep.mubr.msk.f32.mxu1 %vm1153_vm2, %v1108_v32 }
 0x138   : > { %2421 = vmatmul.mubr.msk.f32.vlgmr.msra.gmra.mrb[0].mxu1 %vm1153_vm2, %v1109_v34  ;;  %v1111_v43 = vmax.f32 %v2577_v35, 0.0 }
 0x139   : > { %v1110_v41 = vmax.f32 %v2578_v38, 0.0  ;;  %v2364_v42 = vpop.f32.mrb[6].mxu0  ;;  %2552 = vmatpush3.bf16.msra.mxu1 %v2549_v18 }
 0x13a   : > { %v2579_v44 = vadd.f32 %v2364_v42, %v3055_v19  ;;  %v945_v45 = vpop.f32.mrb[7].mxu0  ;;  %2554 = vmatprep.subr.bf16.mxu1 %v2553_v37 }
 0x13b   : > { %v2580_v47 = vadd.f32 %v3055_v19, %v945_v45  ;;  %2423 = vmatprep.mubr.msk.f32.mxu1 %vm1153_vm2, %v1110_v41 }
 0x13c   : > { %2424 = vmatmul.mubr.msk.f32.gmra.mrb[2].mxu1 %vm1153_vm2, %v1111_v43  ;;  %v1113_v52 = vmax.f32 %v2579_v44, 0.0 }
 0x13d   : > { %v1112_v50 = vmax.f32 %v2580_v47, 0.0  ;;  %v2367_v51 = vpop.f32.mrb[8].mxu0  ;;  %2556 = vmatpush3.bf16.msra.mxu1 %v2553_v37 }
 0x13e   : > { %v2581_v53 = vadd.f32 %v2367_v51, %v3055_v19  ;;  %v955_v54 = vpop.f32.mrb[9].mxu0  ;;  %2558 = vmatprep.subr.bf16.mxu1 %v2557_v46 }
 0x13f   : > { %v2582_v56 = vadd.f32 %v3055_v19, %v955_v54  ;;  %2426 = vmatprep.mubr.msk.f32.mxu1 %vm1153_vm2, %v1112_v50 }
 0x140   : > { %2427 = vmatmul.mubr.msk.f32.gmra.mrb[4].mxu1 %vm1153_vm2, %v1113_v52  ;;  %v1115_v59 = vmax.f32 %v2581_v53, 0.0 }
 0x141   : > { %v1114_v57 = vmax.f32 %v2582_v56, 0.0  ;;  %v2370_v58 = vpop.f32.mrb[10].mxu0  ;;  %2560 = vmatpush3.bf16.msra.mxu1 %v2557_v46 }
 0x142   : > { %v2583_v60 = vadd.f32 %v2370_v58, %v3055_v19  ;;  %v965_v61 = vpop.f32.mrb[11].mxu0  ;;  %2562 = vmatprep.subr.bf16.mxu1 %v2561_v55 }
 0x143   : > { %v2584_v62 = vadd.f32 %v3055_v19, %v965_v61  ;;  %2429 = vmatprep.mubr.msk.f32.mxu1 %vm1153_vm2, %v1114_v57 }
 0x144   : > { %2430 = vmatmul.mubr.msk.f32.gmra.mrb[6].mxu1 %vm1153_vm2, %v1115_v59  ;;  %v1117_v1 = vmax.f32 %v2583_v60, 0.0 }
 0x145   : > { %v1116_v63 = vmax.f32 %v2584_v62, 0.0  ;;  %v2373_v0 = vpop.f32.mrb[12].mxu0  ;;  %2564 = vmatpush3.bf16.msra.mxu1 %v2561_v55  ;;  %v1900_v62 = vld [vmem:[%s3268_s8] sm:$0x3] }
 0x146   : > { %v2585_v2 = vadd.f32 %v2373_v0, %v3055_v19  ;;  %v975_v3 = vpop.f32.mrb[13].mxu0 }
 0x147   : > { %v2586_v4 = vadd.f32 %v3055_v19, %v975_v3  ;;  %2432 = vmatprep.mubr.msk.f32.mxu1 %vm1153_vm2, %v1116_v63  ;;  %v2743_v63 = vmov 0  }
 0x148   : > { %2433 = vmatmul.mubr.msk.f32.gmra.mrb[8].mxu1 %vm1153_vm2, %v1117_v1  ;;  %v1119_v7 = vmax.f32 %v2585_v2, 0.0  ;;  %2677 = vset.pattern.permute.xlu1 %v2743_v63 }
 0x149   : > { %v1118_v5 = vmax.f32 %v2586_v4, 0.0  ;;  %v2376_v6 = vpop.f32.mrb[14].mxu0  ;;  %1903 = vperm.xlu1 %2677, %v1900_v62  }
 0x14a   : > { %v2587_v8 = vadd.f32 %v2376_v6, %v3055_v19  ;;  %v985_v9 = vpop.f32.mrb[15].mxu0 }
 0x14b   : > { %v2588_v10 = vadd.f32 %v3055_v19, %v985_v9  ;;  %2435 = vmatprep.mubr.msk.f32.mxu1 %vm1153_vm2, %v1118_v5 }
 0x14c   : > { %2436 = vmatmul.mubr.msk.f32.gmra.mrb[10].mxu1 %vm1153_vm2, %v1119_v7  ;;  %v1121_v13 = vmax.f32 %v2587_v8, 0.0 }
 0x14d   : > { %v1120_v11 = vmax.f32 %v2588_v10, 0.0  ;;  %v2379_v12 = vpop.f32.mrb[16].mxu0 }
 0x14e   : > { %v2589_v14 = vadd.f32 %v2379_v12, %v3055_v19  ;;  %v995_v15 = vpop.f32.mrb[17].mxu0 }
 0x14f   : > { %v2590_v16 = vadd.f32 %v3055_v19, %v995_v15  ;;  %2438 = vmatprep.mubr.msk.f32.mxu1 %vm1153_vm2, %v1120_v11 }
 0x150   : > { %2439 = vmatmul.mubr.msk.f32.gmra.mrb[12].mxu1 %vm1153_vm2, %v1121_v13  ;;  %v1123_v20 = vmax.f32 %v2589_v14, 0.0 }
 0x151   : > { %v1122_v17 = vmax.f32 %v2590_v16, 0.0  ;;  %v2382_v18 = vpop.f32.mrb[18].mxu0 }
 0x152   : > { %v2591_v21 = vadd.f32 %v2382_v18, %v3055_v19  ;;  %v1005_v22 = vpop.f32.mrb[19].mxu0 }
 0x153   : > { %v2592_v23 = vadd.f32 %v3055_v19, %v1005_v22  ;;  %2441 = vmatprep.mubr.msk.f32.mxu1 %vm1153_vm2, %v1122_v17 }
 0x154   : > { %2442 = vmatmul.mubr.msk.f32.gmra.mrb[14].mxu1 %vm1153_vm2, %v1123_v20  ;;  %v1125_v26 = vmax.f32 %v2591_v21, 0.0 }
 0x155   : > { %v1124_v24 = vmax.f32 %v2592_v23, 0.0  ;;  %v2385_v25 = vpop.f32.mrb[20].mxu0 }
 0x156   : > { %v2593_v27 = vadd.f32 %v2385_v25, %v3055_v19  ;;  %v1015_v28 = vpop.f32.mrb[21].mxu0 }
 0x157   : > { %v2594_v29 = vadd.f32 %v3055_v19, %v1015_v28  ;;  %2444 = vmatprep.mubr.msk.f32.mxu1 %vm1153_vm2, %v1124_v24 }
 0x158   : > { %2445 = vmatmul.mubr.msk.f32.gmra.mrb[16].mxu1 %vm1153_vm2, %v1125_v26  ;;  %v1127_v32 = vmax.f32 %v2593_v27, 0.0 }
 0x159   : > { %v1126_v30 = vmax.f32 %v2594_v29, 0.0  ;;  %v2388_v31 = vpop.f32.mrb[22].mxu0 }
 0x15a   : > { %v2595_v33 = vadd.f32 %v2388_v31, %v3055_v19  ;;  %v1025_v34 = vpop.f32.mrb[23].mxu0 }
 0x15b   : > { %v2596_v35 = vadd.f32 %v3055_v19, %v1025_v34  ;;  %2447 = vmatprep.mubr.msk.f32.mxu1 %vm1153_vm2, %v1126_v30 }
 0x15c   : > { %2448 = vmatmul.mubr.msk.f32.gmra.mrb[18].mxu1 %vm1153_vm2, %v1127_v32  ;;  %v1129_v38 = vmax.f32 %v2595_v33, 0.0 }
 0x15d   : > { %v1128_v36 = vmax.f32 %v2596_v35, 0.0  ;;  %v2391_v37 = vpop.f32.mrb[24].mxu0 }
 0x15e   : > { %v2597_v39 = vadd.f32 %v2391_v37, %v3055_v19  ;;  %v1035_v40 = vpop.f32.mrb[25].mxu0 }
 0x15f   : > { %v2598_v41 = vadd.f32 %v3055_v19, %v1035_v40  ;;  %2450 = vmatprep.mubr.msk.f32.mxu1 %vm1153_vm2, %v1128_v36 }
 0x160   : > { %2451 = vmatmul.mubr.msk.f32.gmra.mrb[20].mxu1 %vm1153_vm2, %v1129_v38  ;;  %v1131_v44 = vmax.f32 %v2597_v39, 0.0 }
 0x161   : > { %v1130_v42 = vmax.f32 %v2598_v41, 0.0  ;;  %v2394_v43 = vpop.f32.mrb[26].mxu0 }
 0x162   : > { %v2599_v45 = vadd.f32 %v2394_v43, %v3055_v19  ;;  %v1045_v46 = vpop.f32.mrb[27].mxu0 }
 0x163   : > { %v2600_v47 = vadd.f32 %v3055_v19, %v1045_v46  ;;  %2453 = vmatprep.mubr.msk.f32.mxu1 %vm1153_vm2, %v1130_v42 }
 0x164   : > { %2454 = vmatmul.mubr.msk.f32.gmra.mrb[22].mxu1 %vm1153_vm2, %v1131_v44  ;;  %v1133_v50 = vmax.f32 %v2599_v45, 0.0 }
 0x165   : > { %v1132_v48 = vmax.f32 %v2600_v47, 0.0  ;;  %v2397_v49 = vpop.f32.mrb[28].mxu0 }
 0x166   : > { %v2601_v51 = vadd.f32 %v2397_v49, %v3055_v19  ;;  %v1055_v52 = vpop.f32.mrb[29].mxu0 }
 0x167   : > { %v2602_v53 = vadd.f32 %v3055_v19, %v1055_v52  ;;  %2456 = vmatprep.mubr.msk.f32.mxu1 %vm1153_vm2, %v1132_v48 }
 0x168   : > { %2457 = vmatmul.mubr.msk.f32.gmra.mrb[24].mxu1 %vm1153_vm2, %v1133_v50  ;;  %v1135_v56 = vmax.f32 %v2601_v51, 0.0 }
 0x169   : > { %v1134_v54 = vmax.f32 %v2602_v53, 0.0  ;;  %v2400_v55 = vpop.f32.mrb[30].mxu0 }
 0x16a   : > { %v2603_v57 = vadd.f32 %v2400_v55, %v3055_v19  ;;  %v1065_v58 = vpop.f32.mrb[31].mxu0 }
 0x16b   : > { %v2604_v59 = vadd.f32 %v3055_v19, %v1065_v58  ;;  %2459 = vmatprep.mubr.msk.f32.mxu1 %vm1153_vm2, %v1134_v54  ;;  %v3146_v19 = vld [vmem:[%s3266_s6] ss:$0 sm:$0xff] }
 0x16c   : > { %2460 = vmatmul.mubr.msk.f32.gmra.mrb[26].mxu1 %vm1153_vm2, %v1135_v56  ;;  %v1137_v61 = vmax.f32 %v2603_v57, 0.0 }
 0x16d   : > { %v1136_v60 = vmax.f32 %v2604_v59, 0.0 }
 0x16f   : > { %2462 = vmatprep.mubr.msk.f32.mxu1 %vm1153_vm2, %v1136_v60 }
 0x170   : > { %2463 = vmatmul.mubr.msk.f32.gmra.mrb[28].mxu1 %vm1153_vm2, %v1137_v61 }
 0x207   : > { %v2419_v0 = vpop.f32.mrb[32].mxu0 }
 0x208   : > { %v1322_v1 = vadd.f32 %v2419_v0, %v3146_v19  ;;  %v1316_v2 = vpop.f32.mrb[33].mxu0 }
 0x209   : > { %v1317_v3 = vadd.f32 %v3146_v19, %v1316_v2 }
 0x20a   : > { %v1476_v6 = vmax.f32 %v1322_v1, 0.0 }
 0x20b   : > { %v1475_v4 = vmax.f32 %v1317_v3, 0.0  ;;  %v2422_v5 = vpop.f32.mrb[0].mxu1 }
 0x20c   : > { %v1332_v7 = vadd.f32 %v2422_v5, %v3146_v19  ;;  %v1326_v8 = vpop.f32.mrb[1].mxu1 }
 0x20d   : > { %v1327_v9 = vadd.f32 %v3146_v19, %v1326_v8  ;;  %2481 = vmatprep.mubr.msk.f32.mxu1 %vm1153_vm2, %v1475_v4 }
 0x20e   : > { %2482 = vmatmul.mubr.msk.f32.vlgmr.msra.gmra.mrb[30].mxu1 %vm1153_vm2, %v1476_v6  ;;  %v1478_v12 = vmax.f32 %v1332_v7, 0.0 }
 0x20f   : > { %v1477_v10 = vmax.f32 %v1327_v9, 0.0  ;;  %v2425_v11 = vpop.f32.mrb[2].mxu1 }
 0x210   : > { %v1342_v13 = vadd.f32 %v2425_v11, %v3146_v19  ;;  %v1336_v14 = vpop.f32.mrb[3].mxu1 }
 0x211   : > { %v1337_v15 = vadd.f32 %v3146_v19, %v1336_v14  ;;  %2484 = vmatprep.mubr.msk.f32.mxu1 %vm1153_vm2, %v1477_v10 }
 0x212   : > { %2485 = vmatmul.mubr.msk.f32.gmra.mrb[32].mxu1 %vm1153_vm2, %v1478_v12  ;;  %v1480_v18 = vmax.f32 %v1342_v13, 0.0 }
 0x213   : > { %v1479_v16 = vmax.f32 %v1337_v15, 0.0  ;;  %v2428_v17 = vpop.f32.mrb[4].mxu1 }
 0x214   : > { %v1352_v20 = vadd.f32 %v2428_v17, %v3146_v19  ;;  %v1346_v21 = vpop.f32.mrb[5].mxu1 }
 0x215   : > { %v1347_v22 = vadd.f32 %v3146_v19, %v1346_v21  ;;  %2487 = vmatprep.mubr.msk.f32.mxu1 %vm1153_vm2, %v1479_v16 }
 0x216   : > { %2488 = vmatmul.mubr.msk.f32.gmra.mrb[34].mxu1 %vm1153_vm2, %v1480_v18  ;;  %v1482_v25 = vmax.f32 %v1352_v20, 0.0 }
 0x217   : > { %v1481_v23 = vmax.f32 %v1347_v22, 0.0  ;;  %v2431_v24 = vpop.f32.mrb[6].mxu1 }
 0x218   : > { %v1362_v26 = vadd.f32 %v2431_v24, %v3146_v19  ;;  %v1356_v27 = vpop.f32.mrb[7].mxu1 }
 0x219   : > { %v1357_v28 = vadd.f32 %v3146_v19, %v1356_v27  ;;  %2490 = vmatprep.mubr.msk.f32.mxu1 %vm1153_vm2, %v1481_v23 }
 0x21a   : > { %2491 = vmatmul.mubr.msk.f32.gmra.mrb[36].mxu1 %vm1153_vm2, %v1482_v25  ;;  %v1484_v31 = vmax.f32 %v1362_v26, 0.0 }
 0x21b   : > { %v1483_v29 = vmax.f32 %v1357_v28, 0.0  ;;  %v2434_v30 = vpop.f32.mrb[8].mxu1 }
 0x21c   : > { %v1372_v32 = vadd.f32 %v2434_v30, %v3146_v19  ;;  %v1366_v33 = vpop.f32.mrb[9].mxu1 }
 0x21d   : > { %v1367_v34 = vadd.f32 %v3146_v19, %v1366_v33  ;;  %2493 = vmatprep.mubr.msk.f32.mxu1 %vm1153_vm2, %v1483_v29 }
 0x21e   : > { %2494 = vmatmul.mubr.msk.f32.gmra.mrb[38].mxu1 %vm1153_vm2, %v1484_v31  ;;  %v1486_v37 = vmax.f32 %v1372_v32, 0.0 }
 0x21f   : > { %v1485_v35 = vmax.f32 %v1367_v34, 0.0  ;;  %v2437_v36 = vpop.f32.mrb[10].mxu1 }
 0x220   : > { %v1382_v38 = vadd.f32 %v2437_v36, %v3146_v19  ;;  %v1376_v39 = vpop.f32.mrb[11].mxu1 }
 0x221   : > { %v1377_v40 = vadd.f32 %v3146_v19, %v1376_v39  ;;  %2496 = vmatprep.mubr.msk.f32.mxu1 %vm1153_vm2, %v1485_v35 }
 0x222   : > { %2497 = vmatmul.mubr.msk.f32.gmra.mrb[40].mxu1 %vm1153_vm2, %v1486_v37  ;;  %v1488_v43 = vmax.f32 %v1382_v38, 0.0 }
 0x223   : > { %v1487_v41 = vmax.f32 %v1377_v40, 0.0  ;;  %v2440_v42 = vpop.f32.mrb[12].mxu1 }
 0x224   : > { %v1392_v44 = vadd.f32 %v2440_v42, %v3146_v19  ;;  %v1386_v45 = vpop.f32.mrb[13].mxu1 }
 0x225   : > { %v1387_v46 = vadd.f32 %v3146_v19, %v1386_v45  ;;  %2499 = vmatprep.mubr.msk.f32.mxu1 %vm1153_vm2, %v1487_v41 }
 0x226   : > { %2500 = vmatmul.mubr.msk.f32.gmra.mrb[42].mxu1 %vm1153_vm2, %v1488_v43  ;;  %v1490_v49 = vmax.f32 %v1392_v44, 0.0 }
 0x227   : > { %v1489_v47 = vmax.f32 %v1387_v46, 0.0  ;;  %v2443_v48 = vpop.f32.mrb[14].mxu1 }
 0x228   : > { %v1402_v50 = vadd.f32 %v2443_v48, %v3146_v19  ;;  %v1396_v51 = vpop.f32.mrb[15].mxu1 }
 0x229   : > { %v1397_v52 = vadd.f32 %v3146_v19, %v1396_v51  ;;  %2502 = vmatprep.mubr.msk.f32.mxu1 %vm1153_vm2, %v1489_v47 }
 0x22a   : > { %2503 = vmatmul.mubr.msk.f32.gmra.mrb[44].mxu1 %vm1153_vm2, %v1490_v49  ;;  %v1492_v55 = vmax.f32 %v1402_v50, 0.0 }
 0x22b   : > { %v1491_v53 = vmax.f32 %v1397_v52, 0.0  ;;  %v2446_v54 = vpop.f32.mrb[16].mxu1 }
 0x22c   : > { %v1412_v56 = vadd.f32 %v2446_v54, %v3146_v19  ;;  %v1406_v57 = vpop.f32.mrb[17].mxu1 }
 0x22d   : > { %v1407_v58 = vadd.f32 %v3146_v19, %v1406_v57  ;;  %2505 = vmatprep.mubr.msk.f32.mxu1 %vm1153_vm2, %v1491_v53 }
 0x22e   : > { %2506 = vmatmul.mubr.msk.f32.gmra.mrb[46].mxu1 %vm1153_vm2, %v1492_v55  ;;  %v1494_v61 = vmax.f32 %v1412_v56, 0.0 }
 0x22f   : > { %v1493_v59 = vmax.f32 %v1407_v58, 0.0  ;;  %v2449_v60 = vpop.f32.mrb[18].mxu1 }
 0x230   : > { %v1422_v62 = vadd.f32 %v2449_v60, %v3146_v19  ;;  %v1416_v0 = vpop.f32.mrb[19].mxu1 }
 0x231   : > { %v1417_v1 = vadd.f32 %v3146_v19, %v1416_v0  ;;  %2508 = vmatprep.mubr.msk.f32.mxu1 %vm1153_vm2, %v1493_v59 }
 0x232   : > { %2509 = vmatmul.mubr.msk.f32.gmra.mrb[48].mxu1 %vm1153_vm2, %v1494_v61  ;;  %v1496_v4 = vmax.f32 %v1422_v62, 0.0 }
 0x233   : > { %v1495_v2 = vmax.f32 %v1417_v1, 0.0  ;;  %v2452_v3 = vpop.f32.mrb[20].mxu1 }
 0x234   : > { %v1432_v5 = vadd.f32 %v2452_v3, %v3146_v19  ;;  %v1426_v6 = vpop.f32.mrb[21].mxu1  ;;  %v1904_v3 = vpop.permute.xlu1 %1903 }
 0x235   : > { %v1427_v7 = vadd.f32 %v3146_v19, %v1426_v6  ;;  %2511 = vmatprep.mubr.msk.f32.mxu1 %vm1153_vm2, %v1495_v2 }
 0x236   : > { %2512 = vmatmul.mubr.msk.f32.gmra.mrb[50].mxu1 %vm1153_vm2, %v1496_v4  ;;  %v1498_v10 = vmax.f32 %v1432_v5, 0.0 }
 0x237   : > { %v1497_v8 = vmax.f32 %v1427_v7, 0.0  ;;  %v2455_v9 = vpop.f32.mrb[22].mxu1 }
 0x238   : > { %v1442_v11 = vadd.f32 %v2455_v9, %v3146_v19  ;;  %v1436_v12 = vpop.f32.mrb[23].mxu1 }
 0x239   : > { %v1437_v13 = vadd.f32 %v3146_v19, %v1436_v12  ;;  %2514 = vmatprep.mubr.msk.f32.mxu1 %vm1153_vm2, %v1497_v8 }
 0x23a   : > { %2515 = vmatmul.mubr.msk.f32.gmra.mrb[52].mxu1 %vm1153_vm2, %v1498_v10  ;;  %v1500_v16 = vmax.f32 %v1442_v11, 0.0 }
 0x23b   : > { %v1499_v14 = vmax.f32 %v1437_v13, 0.0  ;;  %v2458_v15 = vpop.f32.mrb[24].mxu1 }
 0x23c   : > { %v1452_v17 = vadd.f32 %v2458_v15, %v3146_v19  ;;  %v1446_v18 = vpop.f32.mrb[25].mxu1 }
 0x23d   : > { %v1447_v20 = vadd.f32 %v3146_v19, %v1446_v18  ;;  %2517 = vmatprep.mubr.msk.f32.mxu1 %vm1153_vm2, %v1499_v14 }
 0x23e   : > { %2518 = vmatmul.mubr.msk.f32.gmra.mrb[54].mxu1 %vm1153_vm2, %v1500_v16  ;;  %v1502_v23 = vmax.f32 %v1452_v17, 0.0 }
 0x23f   : > { %v1501_v21 = vmax.f32 %v1447_v20, 0.0  ;;  %v2461_v22 = vpop.f32.mrb[26].mxu1 }
 0x240   : > { %v1462_v24 = vadd.f32 %v2461_v22, %v3146_v19  ;;  %v1456_v25 = vpop.f32.mrb[27].mxu1 }
 0x241   : > { %v1457_v26 = vadd.f32 %v3146_v19, %v1456_v25  ;;  %2520 = vmatprep.mubr.msk.f32.mxu1 %vm1153_vm2, %v1501_v21 }
 0x242   : > { %2521 = vmatmul.mubr.msk.f32.gmra.mrb[56].mxu1 %vm1153_vm2, %v1502_v23  ;;  %v1504_v29 = vmax.f32 %v1462_v24, 0.0 }
 0x243   : > { %v1503_v27 = vmax.f32 %v1457_v26, 0.0  ;;  %v2464_v28 = vpop.f32.mrb[28].mxu1 }
 0x244   : > { %v1472_v30 = vadd.f32 %v2464_v28, %v3146_v19  ;;  %v1466_v31 = vpop.f32.mrb[29].mxu1 }
 0x245   : > { %v1467_v32 = vadd.f32 %v3146_v19, %v1466_v31  ;;  %2523 = vmatprep.mubr.msk.f32.mxu1 %vm1153_vm2, %v1503_v27 }
 0x246   : > { %2524 = vmatmul.mubr.msk.f32.gmra.mrb[58].mxu1 %vm1153_vm2, %v1504_v29  ;;  %v1506_v34 = vmax.f32 %v1472_v30, 0.0 }
 0x247   : > { %v1505_v33 = vmax.f32 %v1467_v32, 0.0 }
 0x249   : > { %2526 = vmatprep.mubr.msk.f32.mxu1 %vm1153_vm2, %v1505_v33 }
 0x24a   : > { %2527 = vmatmul.mubr.msk.f32.gmra.mrb[60].mxu1 %vm1153_vm2, %v1506_v34 }
 0x2e1   : > { %v2483_v35 = vpop.f32.mrb[30].mxu1 }
 0x2e2   : > { %v1677_v36 = vpop.f32.mrb[31].mxu1 }
 0x2e3   : > { %1836 = vxpose.xlu0.b32.start [1/16] (narrow) %v1677_v36, 8 }
 0x2e5   : > { %v2486_v37 = vpop.f32.mrb[32].mxu1 }
 0x2e6   : > { %v1687_v38 = vpop.f32.mrb[33].mxu1 }
 0x2e7   : > { %1837 = vxpose.xlu0.b32.cont [2/16] (narrow) %v2483_v35, 8 }
 0x2e9   : > { %v2489_v39 = vpop.f32.mrb[34].mxu1 }
 0x2ea   : > { %v1697_v40 = vpop.f32.mrb[35].mxu1 }
 0x2eb   : > { %1838 = vxpose.xlu0.b32.cont [3/16] (narrow) %v1687_v38, 8 }
 0x2ed   : > { %v2492_v19 = vpop.f32.mrb[36].mxu1 }
 0x2ee   : > { %v1707_v41 = vpop.f32.mrb[37].mxu1 }
 0x2ef   : > { %1839 = vxpose.xlu0.b32.cont [4/16] (narrow) %v2486_v37, 8 }
 0x2f1   : > { %v2495_v42 = vpop.f32.mrb[38].mxu1 }
 0x2f2   : > { %v1717_v43 = vpop.f32.mrb[39].mxu1 }
 0x2f3   : > { %1840 = vxpose.xlu0.b32.cont [5/16] (narrow) %v1697_v40, 8 }
 0x2f5   : > { %v2498_v44 = vpop.f32.mrb[40].mxu1 }
 0x2f6   : > { %v1727_v45 = vpop.f32.mrb[41].mxu1 }
 0x2f7   : > { %1841 = vxpose.xlu0.b32.cont [6/16] (narrow) %v2489_v39, 8 }
 0x2f9   : > { %v2501_v46 = vpop.f32.mrb[42].mxu1 }
 0x2fa   : > { %v1737_v47 = vpop.f32.mrb[43].mxu1 }
 0x2fb   : > { %1842 = vxpose.xlu0.b32.cont [7/16] (narrow) %v1707_v41, 8 }
 0x2fd   : > { %v2504_v48 = vpop.f32.mrb[44].mxu1 }
 0x2fe   : > { %v1747_v49 = vpop.f32.mrb[45].mxu1 }
 0x2ff   : > { %1843 = vxpose.xlu0.b32.cont [8/16] (narrow) %v2492_v19, 8 }
 0x301   : > { %v2507_v50 = vpop.f32.mrb[46].mxu1 }
 0x302   : > { %v1757_v51 = vpop.f32.mrb[47].mxu1 }
 0x303   : > { %1844 = vxpose.xlu0.b32.cont [9/16] (narrow) %v1717_v43, 8  ;;  %1868 = vxpose.xlu1.b32.start [1/16] (narrow) %v1757_v51, 8 }
 0x305   : > { %v2510_v52 = vpop.f32.mrb[48].mxu1 }
 0x306   : > { %v1767_v53 = vpop.f32.mrb[49].mxu1 }
 0x307   : > { %1845 = vxpose.xlu0.b32.cont [10/16] (narrow) %v2495_v42, 8  ;;  %1869 = vxpose.xlu1.b32.cont [2/16] (narrow) %v2507_v50, 8 }
 0x309   : > { %v2513_v54 = vpop.f32.mrb[50].mxu1 }
 0x30a   : > { %v1777_v55 = vpop.f32.mrb[51].mxu1 }
 0x30b   : > { %1846 = vxpose.xlu0.b32.cont [11/16] (narrow) %v1727_v45, 8  ;;  %1870 = vxpose.xlu1.b32.cont [3/16] (narrow) %v1767_v53, 8 }
 0x30d   : > { %v2516_v56 = vpop.f32.mrb[52].mxu1 }
 0x30e   : > { %v1787_v57 = vpop.f32.mrb[53].mxu1 }
 0x30f   : > { %1847 = vxpose.xlu0.b32.cont [12/16] (narrow) %v2498_v44, 8  ;;  %1871 = vxpose.xlu1.b32.cont [4/16] (narrow) %v2510_v52, 8 }
 0x311   : > { %v2519_v58 = vpop.f32.mrb[54].mxu1 }
 0x312   : > { %v1797_v59 = vpop.f32.mrb[55].mxu1 }
 0x313   : > { %1848 = vxpose.xlu0.b32.cont [13/16] (narrow) %v1737_v47, 8  ;;  %1872 = vxpose.xlu1.b32.cont [5/16] (narrow) %v1777_v55, 8 }
 0x315   : > { %v2522_v60 = vpop.f32.mrb[56].mxu1 }
 0x316   : > { %v1807_v61 = vpop.f32.mrb[57].mxu1 }
 0x317   : > { %1849 = vxpose.xlu0.b32.cont [14/16] (narrow) %v2501_v46, 8  ;;  %1873 = vxpose.xlu1.b32.cont [6/16] (narrow) %v2513_v54, 8 }
 0x319   : > { %v2525_v62 = vpop.f32.mrb[58].mxu1 }
 0x31a   : > { %v1817_v0 = vpop.f32.mrb[59].mxu1 }
 0x31b   : > { %1850 = vxpose.xlu0.b32.cont [15/16] (narrow) %v1747_v49, 8  ;;  %1874 = vxpose.xlu1.b32.cont [7/16] (narrow) %v1787_v57, 8 }
 0x31d   : > { %v2528_v1 = vpop.f32.mrb[60].mxu1 }
 0x31e   : > { %v1827_v2 = vpop.f32.mrb[61].mxu1 }
 0x31f   : > { %1851 = vxpose.xlu0.b32.end [16/16] (narrow) %v2504_v48, 8  ;;  %1875 = vxpose.xlu1.b32.cont [8/16] (narrow) %v2516_v56, 8 }
 0x323   : > { %1876 = vxpose.xlu1.b32.cont [9/16] (narrow) %v1797_v59, 8 }
 0x327   : > { %1877 = vxpose.xlu1.b32.cont [10/16] (narrow) %v2519_v58, 8 }
 0x32b   : > { %1878 = vxpose.xlu1.b32.cont [11/16] (narrow) %v1807_v61, 8 }
 0x32f   : > { %1879 = vxpose.xlu1.b32.cont [12/16] (narrow) %v2522_v60, 8 }
 0x333   : > { %1880 = vxpose.xlu1.b32.cont [13/16] (narrow) %v1817_v0, 8 }
 0x337   : > { %1881 = vxpose.xlu1.b32.cont [14/16] (narrow) %v2525_v62, 8 }
 0x33b   : > { %1882 = vxpose.xlu1.b32.cont [15/16] (narrow) %v1827_v2, 8 }
 0x33f   : > { %1883 = vxpose.xlu1.b32.end [16/16] (narrow) %v2528_v1, 8 }
 0x348   : > { %2678 = vset.pattern.permute.xlu0 %v2743_v63 }
 0x363   : > { %v1852_v4 = vpop.trf.xlu0 }
 0x364   : > { %v1906_v6 = vadd.f32 %v1904_v3, %v1852_v4 }
 0x383   : > { %v1884_v5 = vpop.trf.xlu1 }
 0x384   : > { %v1907_v7 = vadd.f32 %v1904_v3, %v1884_v5 }
 0x386   : > { %v1910_v8 = vcombine.low %v1906_v6, %v1907_v7 }
 0x388   : > { %2145 = vst.sshfl [vmem:[%s342_s28] sm:$0x33 pattern:$0x76325410] %v1910_v8 }
 0x389   : > { %2692 = shalt.err (!%p2689_p3)
}
 0x38a   : > { %s2693_s14 = scalar_lea.hbm %s3218_s22, 64  ;;  %s2697_s28 = scalar_lea.hbm %s3269_s9, 256 }
 0x38b   : > { %p2694_p4 = scmp.ne.s32.totalorder %s3218_s22, %s2693_s14  ;;  %p2698_p9 = scmp.lt.u32.totalorder %s3218_s22, %s3269_s9 }
 0x38c   : > { %p2699_p10 = scmp.lt.u32.totalorder %s2697_s28, %s2693_s14  ;;  %p2701_p12 = scmp.lt.u32.totalorder %s2693_s14, %s3218_s22 }
 0x38d   : > { %p2695_p7 = pnand %p2694_p4, %p2833_p5 }
 0x38e   : > { %p2700_p11 = por %p2699_p10, %p2698_p9 }
 0x38f   : > { %p2696_p8 = pneg %p2695_p7 }
 0x390   : > { %p2702_p13 = por %p2701_p12, %p2700_p11 }
 0x392   : > { %p2703_p0 = pnand %p2702_p13, %p2696_p8 }
 0x394   : > { %2706 = shalt.err (!%p2703_p0)
}
 0x395   : > { %2637 = dma.vmem_to_hbm [thread:$0]  (%p2833_p5), %s3220_s23, 64, %s3218_s22, %s1921_s24  }
 0x396 PF: > { %p2643_p1 = scmp.ge.s32.totalorder %s2741_s12, 2  ;;  %s1947_s26 = sand.u32 1, %s2729_s30  }
 0x397   : > { %s1948_s13 = scalar_lea.sflag [#allocation3], %s1947_s26 }
 0x398   : > { %p2640_p2 = pnand %p2643_p1, %p2837_p6 }
 0x39a   : > { %2724 = dma.done.wait (!%p2640_p2), %s1948_s13, 64  }
 0x39b   : > { %2726 = vsyncadd (!%p2640_p2), %s1948_s13, 4294967232  ;;  %p19_p3 = scmp.ge.s32.totalorder %s2820_s15, 6   ;;  %s3272_s30 = smov %s2733_s10 }
 0x39c   : > { %s3273_s10 = smov %s2737_s11  ;;  %s3274_s11 = smov %s2831_s18 }
 0x39d   : > { %s3275_s12 = smov %s2820_s15  ;;  %21 = sbr.rel (!%p19_p3) target bundleno = 3 (0x3), region = 94 }
 0x3a4   :  { %1953 = vsyncpa [#allocation3], 1 }
 0x3a5   :  { %1955 = vsyncpa [#allocation3 + $0x1], 1 }

</bundles_post_ra>
